<compile_context>
chip_gen: v7x
topology: tpu7x:2x2x1
jax: 0.10.0
libtpu: 0.0.40
codegen_flags: <defaults>
</compile_context>

<pallas_src>
import functools

import jax
import jax.numpy as jnp
from jax import lax
from jax.experimental import pallas as pl
from jax.experimental.pallas import tpu as pltpu

BN_EPS = 1e-5


def _round_up(x, m):
    return ((x + m - 1) // m) * m


# --------------------------- Pass 1: BN statistics ---------------------------

def bn_stats_kernel(x_ref, gamma_ref, beta_ref, s_ref, t_ref,
                    sum_ref, sumsq_ref, *, n_rows):
    """Accumulate per-feature sum / sumsq over B-tiles; finalize folded s, t."""
    i = pl.program_id(0)

    @pl.when(i == 0)
    def _init():
        sum_ref[...] = jnp.zeros_like(sum_ref)
        sumsq_ref[...] = jnp.zeros_like(sumsq_ref)

    x = x_ref[...].astype(jnp.float32)
    sum_ref[...] += jnp.sum(x, axis=0, keepdims=True)
    sumsq_ref[...] += jnp.sum(x * x, axis=0, keepdims=True)

    @pl.when(i == pl.num_programs(0) - 1)
    def _finalize():
        inv_n = jnp.float32(1.0 / n_rows)          # true batch size (pad rows are 0)
        mean = sum_ref[...] * inv_n
        var = jnp.maximum(sumsq_ref[...] * inv_n - mean * mean, 0.0)  # biased var
        inv_std = lax.rsqrt(var + jnp.float32(BN_EPS))
        s = gamma_ref[...].astype(jnp.float32) * inv_std
        s_ref[...] = s
        t_ref[...] = beta_ref[...].astype(jnp.float32) - mean * s


# ----------------------- Pass 2: folded BN + Linear --------------------------

def bn_linear_kernel(x_ref, s_ref, t_ref, w_ref, bias_ref, o_ref, *, use_bf16):
    # x: (tB, Dp), s/t: (1, Dp), w: (tC, Dp) PyTorch layout, bias: (1, tC)
    nt_dims = (((1,), (1,)), ((), ()))             # contract on D (NT matmul)

    xs = x_ref[...].astype(jnp.float32) * s_ref[...]   # fold BN scale into x (free sublane bcast)
    w = w_ref[...]

    if use_bf16:
        acc = lax.dot_general(xs.astype(jnp.bfloat16), w.astype(jnp.bfloat16),
                              nt_dims, preferred_element_type=jnp.float32)
    else:
        acc = lax.dot_general(xs, w.astype(jnp.float32),
                              nt_dims, preferred_element_type=jnp.float32)

    # BN additive part folded to a single (1, tC) row; kept in f32 for accuracy.
    off = lax.dot_general(t_ref[...], w.astype(jnp.float32),
                          nt_dims, preferred_element_type=jnp.float32)
    off = off + bias_ref[...].astype(jnp.float32)

    o_ref[...] = (acc + off).astype(o_ref.dtype)


# --------------------------------- wrapper -----------------------------------

def class_block_bn_linear(x, gamma, beta, weight, bias, *,
                          block_b=None, block_c=None, use_bf16=True):
    """Fused BatchNorm1d (training-mode batch stats) + Linear.

    x:      (B, D)
    gamma:  (D,)   BN weight
    beta:   (D,)   BN bias
    weight: (C, D) Linear weight (PyTorch layout; consumed as-is, no transpose)
    bias:   (C,)   Linear bias
    returns (B, C)
    """
    B, D = x.shape
    C = weight.shape[0]

    # Lane-dense padding targets (128 also fills v5e's 128-wide MXU).
    Dp = _round_up(D, 128)
    Cp = _round_up(C, 128)

    tC = block_c if block_c is not None else (256 if Cp % 256 == 0 else 128)
    assert tC % 128 == 0 and Cp % tC == 0
    tB = block_b if block_b is not None else 128
    tB = min(tB, _round_up(B, 8))
    assert tB % 8 == 0 or tB == B
    Bp = _round_up(B, tB)
    # VMEM note (v7x, 32 MiB scoped): per-step live ~= 2*(tB*Dp + tC*Dp)*4B
    # + out tile; with tB<=128, tC<=256 this stays well under the ceiling for
    # D up to several thousand, so no vmem_limit_bytes override is needed.

    f32 = jnp.float32
    # Input padding (no-op when already aligned).
    x_p = jnp.pad(x, ((0, Bp - B), (0, Dp - D)))
    # Parameter padding: cheap, and in real deployments should be hoisted out
    # of the per-step hot path (parameters are static across calls).
    gamma_p = jnp.pad(gamma.reshape(1, D).astype(f32), ((0, 0), (0, Dp - D)))
    beta_p = jnp.pad(beta.reshape(1, D).astype(f32), ((0, 0), (0, Dp - D)))
    w_p = jnp.pad(weight, ((0, Cp - C), (0, Dp - D)))
    bias_p = jnp.pad(bias.reshape(1, C), ((0, 0), (0, Cp - C)))

    # ---- Pass 1: batch stats -> folded (s, t) rows --------------------------
    s_vec, t_vec = pl.pallas_call(
        functools.partial(bn_stats_kernel, n_rows=B),
        out_shape=(jax.ShapeDtypeStruct((1, Dp), f32),
                   jax.ShapeDtypeStruct((1, Dp), f32)),
        grid_spec=pltpu.PrefetchScalarGridSpec(
            num_scalar_prefetch=0,
            grid=(Bp // tB,),
            in_specs=[
                pl.BlockSpec((tB, Dp), lambda i: (i, 0)),   # x tile
                pl.BlockSpec((1, Dp), lambda i: (0, 0)),    # gamma
                pl.BlockSpec((1, Dp), lambda i: (0, 0)),    # beta
            ],
            out_specs=[
                pl.BlockSpec((1, Dp), lambda i: (0, 0)),    # s (resident)
                pl.BlockSpec((1, Dp), lambda i: (0, 0)),    # t (resident)
            ],
            scratch_shapes=[pltpu.VMEM((1, Dp), f32),       # running sum
                            pltpu.VMEM((1, Dp), f32)],      # running sumsq
        ),
        compiler_params=pltpu.CompilerParams(
            dimension_semantics=("arbitrary",)),
    )(x_p, gamma_p, beta_p)

    # ---- Pass 2: folded BN + Linear, tiled over (B, C) ----------------------
    out_p = pl.pallas_call(
        functools.partial(bn_linear_kernel, use_bf16=use_bf16),
        out_shape=jax.ShapeDtypeStruct((Bp, Cp), x.dtype),
        grid_spec=pltpu.PrefetchScalarGridSpec(
            num_scalar_prefetch=0,
            grid=(Bp // tB, Cp // tC),
            in_specs=[
                pl.BlockSpec((tB, Dp), lambda i, j: (i, 0)),   # x tile
                pl.BlockSpec((1, Dp), lambda i, j: (0, 0)),    # s
                pl.BlockSpec((1, Dp), lambda i, j: (0, 0)),    # t
                pl.BlockSpec((tC, Dp), lambda i, j: (j, 0)),   # W (C, D) tile
                pl.BlockSpec((1, tC), lambda i, j: (0, j)),    # bias tile
            ],
            out_specs=pl.BlockSpec((tB, tC), lambda i, j: (i, j)),
        ),
        compiler_params=pltpu.CompilerParams(
            dimension_semantics=("parallel", "parallel")),
    )(x_p, s_vec, t_vec, w_p, bias_p)

    return out_p[:B, :C]


# -------------------------------- reference ----------------------------------

def reference(x, gamma, beta, weight, bias):
    x = x.astype(jnp.float32)
    mean = jnp.mean(x, axis=0, keepdims=True)
    var = jnp.mean((x - mean) ** 2, axis=0, keepdims=True)
    y = (x - mean) / jnp.sqrt(var + BN_EPS) * gamma + beta
    return jnp.dot(y, weight.T, precision=lax.Precision.HIGHEST) + bias


if __name__ == "__main__":
    key = jax.random.PRNGKey(0)
    B, D, C = 24, 32, 16  # batch, input_dim, class_num (small demo sizes)

    k_x, k_w = jax.random.split(key)
    x = jax.random.normal(k_x, (B, D), dtype=jnp.float32)

    # Parameter init mirroring the PyTorch module:
    #  - BatchNorm1d: weight=1, bias=0 (weights_init_classifier skips BN)
    #  - Linear: weight ~ N(0, 0.001), bias = 0
    gamma = jnp.ones((D,), jnp.float32)
    beta = jnp.zeros((D,), jnp.float32)
    weight = 0.001 * jax.random.normal(k_w, (C, D), dtype=jnp.float32)
    bias = jnp.zeros((C,), jnp.float32)

    ref = reference(x, gamma, beta, weight, bias)

    # f32-operand MXU path (exercises multi-tile stats accumulation, block_b=8)
    out_f32 = jax.block_until_ready(
        class_block_bn_linear(x, gamma, beta, weight, bias,
                              block_b=8, use_bf16=False))
    assert out_f32.shape == (B, C)
    assert jnp.allclose(out_f32, ref, atol=1e-4, rtol=1e-4)

    # default path: bf16 MXU operands, f32 accumulation + f32 BN offset
    out_bf16 = jax.block_until_ready(
        class_block_bn_linear(x, gamma, beta, weight, bias, block_b=8))
    assert out_bf16.shape == (B, C)
    assert jnp.allclose(out_bf16, ref, atol=1e-3, rtol=1e-2)

    print("KERNEL_OK")
</pallas_src>

<mosaic_0001>
module attributes {stable_mosaic.version = 11 : i64} {
  func.func @bn_stats_kernel(%arg0: i32, %arg1: memref<8x128xf32, #tpu.memory_space<vmem>>, %arg2: memref<1x128xf32, #tpu.memory_space<vmem>>, %arg3: memref<1x128xf32, #tpu.memory_space<vmem>>, %arg4: memref<1x128xf32, #tpu.memory_space<vmem>>, %arg5: memref<1x128xf32, #tpu.memory_space<vmem>>, %arg6: memref<1x128xf32, #tpu.memory_space<vmem>>, %arg7: memref<1x128xf32, #tpu.memory_space<vmem>>) attributes {dimension_semantics = [#tpu.dimension_semantics<arbitrary>], iteration_bounds = array<i64: 3>, scalar_prefetch = 0 : i64, scratch_operands = 2 : i64, tpu.core_type = #tpu.core_type<tc>, window_params = [{transform_indices = @transform_0, window_bounds = array<i64: 8, 128>}, {pipeline_mode = #tpu.pipeline_mode<synchronous>, transform_indices = @transform_1, window_bounds = array<i64: 1, 128>}, {pipeline_mode = #tpu.pipeline_mode<synchronous>, transform_indices = @transform_2, window_bounds = array<i64: 1, 128>}, {pipeline_mode = #tpu.pipeline_mode<synchronous>, transform_indices = @transform_3, window_bounds = array<i64: 1, 128>}, {pipeline_mode = #tpu.pipeline_mode<synchronous>, transform_indices = @transform_4, window_bounds = array<i64: 1, 128>}]} {
    %c0_i32 = arith.constant 0 : i32
    %0 = arith.cmpi eq, %arg0, %c0_i32 : i32
    %1 = arith.extui %0 : i1 to i32
    %c0_i32_0 = arith.constant 0 : i32
    %2 = arith.cmpi ne, %1, %c0_i32_0 : i32
    scf.if %2 {
      %cst_12 = arith.constant 0.000000e+00 : f32
      %18 = vector.broadcast %cst_12 : f32 to vector<1x128xf32>
      %c0_13 = arith.constant 0 : index
      %c0_14 = arith.constant 0 : index
      %19 = vector.load %arg6[%c0_13, %c0_14] : memref<1x128xf32, #tpu.memory_space<vmem>>, vector<1x128xf32>
      tpu.vector_store %arg6[%c0_13, %c0_14], %18 {strides = array<i32>} : memref<1x128xf32, #tpu.memory_space<vmem>>, vector<1x128xf32>,
      %cst_15 = arith.constant 0.000000e+00 : f32
      %20 = vector.broadcast %cst_15 : f32 to vector<1x128xf32>
      %c0_16 = arith.constant 0 : index
      %c0_17 = arith.constant 0 : index
      %21 = vector.load %arg7[%c0_16, %c0_17] : memref<1x128xf32, #tpu.memory_space<vmem>>, vector<1x128xf32>
      tpu.vector_store %arg7[%c0_16, %c0_17], %20 {strides = array<i32>} : memref<1x128xf32, #tpu.memory_space<vmem>>, vector<1x128xf32>,
    } else {
    }
    %c0 = arith.constant 0 : index
    %c0_1 = arith.constant 0 : index
    %3 = vector.load %arg1[%c0, %c0_1] : memref<8x128xf32, #tpu.memory_space<vmem>>, vector<8x128xf32>
    %c0_2 = arith.constant 0 : index
    %c0_3 = arith.constant 0 : index
    %4 = vector.load %arg6[%c0_2, %c0_3] : memref<1x128xf32, #tpu.memory_space<vmem>>, vector<1x128xf32>
    %cst = arith.constant dense<0.000000e+00> : vector<128xf32>
    %5 = vector.multi_reduction <add>, %3, %cst [0] : vector<8x128xf32> to vector<128xf32>
    %6 = vector.shape_cast %5 : vector<128xf32> to vector<1x128xf32>
    %7 = arith.addf %4, %6 : vector<1x128xf32>
    %c0_4 = arith.constant 0 : index
    %c0_5 = arith.constant 0 : index
    %8 = vector.load %arg6[%c0_4, %c0_5] : memref<1x128xf32, #tpu.memory_space<vmem>>, vector<1x128xf32>
    tpu.vector_store %arg6[%c0_4, %c0_5], %7 {strides = array<i32>} : memref<1x128xf32, #tpu.memory_space<vmem>>, vector<1x128xf32>,
    %c0_6 = arith.constant 0 : index
    %c0_7 = arith.constant 0 : index
    %9 = vector.load %arg7[%c0_6, %c0_7] : memref<1x128xf32, #tpu.memory_space<vmem>>, vector<1x128xf32>
    %10 = arith.mulf %3, %3 : vector<8x128xf32>
    %cst_8 = arith.constant dense<0.000000e+00> : vector<128xf32>
    %11 = vector.multi_reduction <add>, %10, %cst_8 [0] : vector<8x128xf32> to vector<128xf32>
    %12 = vector.shape_cast %11 : vector<128xf32> to vector<1x128xf32>
    %13 = arith.addf %9, %12 : vector<1x128xf32>
    %c0_9 = arith.constant 0 : index
    %c0_10 = arith.constant 0 : index
    %14 = vector.load %arg7[%c0_9, %c0_10] : memref<1x128xf32, #tpu.memory_space<vmem>>, vector<1x128xf32>
    tpu.vector_store %arg7[%c0_9, %c0_10], %13 {strides = array<i32>} : memref<1x128xf32, #tpu.memory_space<vmem>>, vector<1x128xf32>,
    %c2_i32 = arith.constant 2 : i32
    %15 = arith.cmpi eq, %arg0, %c2_i32 : i32
    %16 = arith.extui %15 : i1 to i32
    %c0_i32_11 = arith.constant 0 : i32
    %17 = arith.cmpi ne, %16, %c0_i32_11 : i32
    scf.if %17 {
      %c0_12 = arith.constant 0 : index
      %c0_13 = arith.constant 0 : index
      %18 = vector.load %arg6[%c0_12, %c0_13] : memref<1x128xf32, #tpu.memory_space<vmem>>, vector<1x128xf32>
      %cst_14 = arith.constant 0.0416666679 : f32
      %19 = vector.broadcast %cst_14 : f32 to vector<1x128xf32>
      %20 = arith.mulf %18, %19 : vector<1x128xf32>
      %c0_15 = arith.constant 0 : index
      %c0_16 = arith.constant 0 : index
      %21 = vector.load %arg7[%c0_15, %c0_16] : memref<1x128xf32, #tpu.memory_space<vmem>>, vector<1x128xf32>
      %cst_17 = arith.constant 0.0416666679 : f32
      %22 = vector.broadcast %cst_17 : f32 to vector<1x128xf32>
      %23 = arith.mulf %21, %22 : vector<1x128xf32>
      %24 = arith.mulf %20, %20 : vector<1x128xf32>
      %25 = arith.subf %23, %24 : vector<1x128xf32>
      %cst_18 = arith.constant 0.000000e+00 : f32
      %26 = vector.broadcast %cst_18 : f32 to vector<1x128xf32>
      %27 = arith.maximumf %25, %26 : vector<1x128xf32>
      %cst_19 = arith.constant 9.99999974E-6 : f32
      %28 = vector.broadcast %cst_19 : f32 to vector<1x128xf32>
      %29 = arith.addf %27, %28 : vector<1x128xf32>
      %30 = math.rsqrt %29 : vector<1x128xf32>
      %c0_20 = arith.constant 0 : index
      %c0_21 = arith.constant 0 : index
      %31 = vector.load %arg2[%c0_20, %c0_21] : memref<1x128xf32, #tpu.memory_space<vmem>>, vector<1x128xf32>
      %32 = arith.mulf %31, %30 : vector<1x128xf32>
      %c0_22 = arith.constant 0 : index
      %c0_23 = arith.constant 0 : index
      %33 = vector.load %arg4[%c0_22, %c0_23] : memref<1x128xf32, #tpu.memory_space<vmem>>, vector<1x128xf32>
      tpu.vector_store %arg4[%c0_22, %c0_23], %32 {strides = array<i32>} : memref<1x128xf32, #tpu.memory_space<vmem>>, vector<1x128xf32>,
      %c0_24 = arith.constant 0 : index
      %c0_25 = arith.constant 0 : index
      %34 = vector.load %arg3[%c0_24, %c0_25] : memref<1x128xf32, #tpu.memory_space<vmem>>, vector<1x128xf32>
      %35 = arith.mulf %20, %32 : vector<1x128xf32>
      %36 = arith.subf %34, %35 : vector<1x128xf32>
      %c0_26 = arith.constant 0 : index
      %c0_27 = arith.constant 0 : index
      %37 = vector.load %arg5[%c0_26, %c0_27] : memref<1x128xf32, #tpu.memory_space<vmem>>, vector<1x128xf32>
      tpu.vector_store %arg5[%c0_26, %c0_27], %36 {strides = array<i32>} : memref<1x128xf32, #tpu.memory_space<vmem>>, vector<1x128xf32>,
    } else {
    }
    return
  }
  func.func @transform_0(%arg0: i32) -> (i32, i32) {
    %c0_i32 = arith.constant 0 : i32
    %c0_i32_0 = arith.constant 0 : i32
    return %arg0, %c0_i32 : i32, i32
  }
  func.func @transform_1(%arg0: i32) -> (i32, i32) {
    %c0_i32 = arith.constant 0 : i32
    %c0_i32_0 = arith.constant 0 : i32
    %c0_i32_1 = arith.constant 0 : i32
    return %c0_i32, %c0_i32_0 : i32, i32
  }
  func.func @transform_2(%arg0: i32) -> (i32, i32) {
    %c0_i32 = arith.constant 0 : i32
    %c0_i32_0 = arith.constant 0 : i32
    %c0_i32_1 = arith.constant 0 : i32
    return %c0_i32, %c0_i32_0 : i32, i32
  }
  func.func @transform_3(%arg0: i32) -> (i32, i32) {
    %c0_i32 = arith.constant 0 : i32
    %c0_i32_0 = arith.constant 0 : i32
    %c0_i32_1 = arith.constant 0 : i32
    return %c0_i32, %c0_i32_0 : i32, i32
  }
  func.func @transform_4(%arg0: i32) -> (i32, i32) {
    %c0_i32 = arith.constant 0 : i32
    %c0_i32_0 = arith.constant 0 : i32
    %c0_i32_1 = arith.constant 0 : i32
    return %c0_i32, %c0_i32_0 : i32, i32
  }
}

</mosaic_0001>

<bundles_post_ra>
// kernel: tpu_custom_call.1
= control target key start
LH: loop header
LB: loop body
LE: loop exit
PB: predicated region body
PF: predicated region fallthrough
CT: control target
= control target key end

     0   :  { %10 = vsyncpa [#allocation5], 0  ;;  %s706_s0 = inlined_call_operand.hbm [shape: f32[24,128], index: 0, kind: input, shape index: {}]   ;;  %s707_s1 = inlined_call_operand.vmem [shape: f32[1,128], index: 1, kind: input, shape index: {}]   ;;  %s708_s2 = inlined_call_operand.vmem [shape: f32[1,128], index: 2, kind: input, shape index: {}]   ;;  %s709_s3 = inlined_call_operand.hbm [shape: f32[1,128], index: 3, kind: output, shape index: {0}]   ;;  %s710_s4 = inlined_call_operand.hbm [shape: f32[1,128], index: 4, kind: output, shape index: {1}]  }
   0x1   :  { %12 = vsyncpa [#allocation5 + $0x1], 0 }
   0x2   :  { %13 = vsyncpa [#allocation6], 0 }
   0x3   :  { %14 = vsyncpa [#allocation9], 0  ;;  %s551_s15 = smov 0   ;;  %s553_s16 = smov 0  }
   0x4   :  { %s555_s17 = smov 0   ;;  %s557_s18 = smov 0  }
   0x5 LB: > { %s570_s19 = sadd.s32 4294967295, %s520_s18   ;;  %s573_s20 = sadd.s32 1, %s520_s18   ;;  %s520_s18 = sphi %s557_s18, %s718_s18   ;;  %s516_s17 = sphi %s555_s17, %s717_s17   ;;  %s512_s16 = sphi %s553_s16, %s716_s16   ;;  %s508_s15 = sphi %s551_s15, %s715_s15  }
   0x6   : > { %s24_s21 = ssub.s32 %s520_s18, %s573_s20  ;;  %s27_s22 = sadd.s32 1, %s516_s17 }
   0x7   : > { %p25_p0 = scmp.eq.s32.totalorder %s24_s21, 0  ;;  %p34_p1 = scmp.ne.s32.totalorder %s516_s17, %s512_s16 }
   0x8   : > { %p35_p2 = scmp.eq.s32.totalorder %s520_s18, 0  ;;  %p40_p3 = scmp.ne.s32.totalorder %s512_s16, %s508_s15 }
   0x9   : > { %s583_s23 = scalar_select %p25_p0, %s516_s17, %s27_s22  }
   0xa   : > { %p36_p4 = por %p35_p2, %p34_p1  ;;  %p41_p5 = scmp.eq.s32.totalorder %s570_s19, 0 }
   0xb   : > { %p354_p6 = scmp.lt.s32.totalorder %s520_s18, 3  ;;  %s154_s25 = sand.u32 1, %s516_s17  }
   0xc   : > { %p587_p7 = por %p41_p5, %p40_p3  ;;  %s328_s26 = sshll.u32 %s154_s25, 3 }
   0xd   : > { %s329_s27 = sshll.u32 %s520_s18, 7  ;;  %s158_s5 = scalar_lea.vmem [#allocation4], %s328_s26 }
   0xe   : > { %s596_s30 = scalar_lea.hbm %s706_s0, %s329_s27  ;;  %s165_s6 = sshll.u32 %s158_s5, 4  ;;  %s598_s6 = int_to_ptr.vmem [resolvable:$true] %s165_s6 }
   0xf   : > { %p600_p8 = pnand %p354_p6, %p36_p4  ;;  %s155_s8 = scalar_lea.sflag [#allocation5], %s154_s25 }
  0x10   : > { %s396_s9 = scalar_lea.hbm %s596_s30, 128  ;;  %s401_s12 = scalar_lea.hbm %s706_s0, 384 }
  0x11   : > { %p397_p11 = scmp.ne.s32.totalorder %s596_s30, %s396_s9  ;;  %p398_p12 = pneg %p600_p8 }
  0x12   : > { %p402_p1 = scmp.lt.u32.totalorder %s596_s30, %s706_s0  ;;  %p403_p2 = scmp.lt.u32.totalorder %s401_s12, %s396_s9 }
  0x13   : > { %p399_p13 = pnand %p398_p12, %p397_p11  ;;  %p405_p4 = scmp.lt.u32.totalorder %s396_s9, %s596_s30 }
  0x14   : > { %p404_p3 = por %p403_p2, %p402_p1 }
  0x15   : > { %p400_p0 = pneg %p399_p13 }
  0x16   : > { %p406_p5 = por %p405_p4, %p404_p3 }
  0x18   : > { %p407_p6 = pnand %p406_p5, %p400_p0 }
  0x1a   : > { %410 = shalt.err (!%p407_p6)
}
  0x1b   : > { %s411_s15 = scalar_lea.vmem %s598_s6, 128  ;;  %s522_s21 = smov [#allocation4]  }
  0x1c   : > { %p412_p11 = scmp.ne.s32.totalorder %s598_s6, %s411_s15  ;;  %s416_s22 = sshll.u32 %s522_s21, 4  ;;  %s417_s22 = int_to_ptr.vmem [resolvable:$false] %s416_s22 }
  0x1d   : > { %s418_s25 = scalar_lea.vmem %s417_s22, 256  ;;  %p419_p10 = scmp.lt.s32.totalorder %s598_s6, %s417_s22 }
  0x1e   : > { %p414_p13 = pnand %p412_p11, %p398_p12  ;;  %p420_p1 = scmp.lt.s32.totalorder %s418_s25, %s411_s15 }
  0x20   : > { %p415_p9 = pneg %p414_p13  ;;  %p421_p2 = por %p420_p1, %p419_p10 }
  0x22   : > { %p422_p3 = pnand %p421_p2, %p415_p9 }
  0x24   : > { %425 = shalt.err (!%p422_p3)
}
  0x25   : > { %353 = dma.hbm_to_vmem [thread:$0]  (!%p600_p8), %s596_s30, 128, %s598_s6, %s155_s8  }
  0x26   : > { %p713_p0 = scmp.lt.s32.totalorder %s520_s18, 4  ;;  %p714_p4 = scmp.ge.s32.totalorder %s520_s18, 1 }
  0x28   : > { %p171_p12 = pnand %p714_p4, %p713_p0 }
  0x29   : > { %s176_s26 = sand.u32 (!%p171_p12), 1, %s512_s16  }
  0x2a   : > { %174 = sbr.rel (%p171_p12) target bundleno = 158 (0x9e), region = 32  ;;  %s331_s27 = sshll.u32 (!%p171_p12), %s176_s26, 3 }
  0x2b   : > { %s177_s28 = scalar_lea.sflag (!%p171_p12), [#allocation5], %s176_s26  ;;  %s180_s29 = scalar_lea.vmem (!%p171_p12), [#allocation4], %s331_s27 }
  0x31   : > { %495 = dma.done.wait (%p587_p7), %s177_s28, 128  }
  0x32   : > { %497 = vsyncadd (%p587_p7), %s177_s28, 4294967168  ;;  %p332_p9 = scmp.ne.s32.totalorder %s570_s19, 0 }
  0x33   : > { %v523_v0 = vmov (!%p332_p9), 0.0  }
  0x34   : > { %203 = sbr.rel (%p332_p9) target bundleno = 59 (0x3b), region = 40  ;;  %204 = vst [vmem:[#allocation2] sm:$0x1] (!%p332_p9), %v523_v0  ;;  %205 = vst [vmem:[#allocation3] sm:$0x1] (!%p332_p9), %v523_v0 }
  0x3b PF: > { %v206_v1 = vld [vmem:[%s180_s29] sm:$0xff]  ;;  %v207_v12 = vld [vmem:[#allocation2] sm:$0x1]  ;;  %v216_v15 = vld [vmem:[#allocation3] sm:$0x1]  ;;  %p333_p7 = scmp.ne.s32.totalorder %s570_s19, 2 }
  0x3c   : > { %v208_v2 = vrot.slane %v206_v1, 4  ;;  %v217_v3 = vmul.f32 %v206_v1, %v206_v1  ;;  %v239_v27 = vld [vmem:[%s707_s1] sm:$0x1] (!%p333_p7) }
  0x3d   : > { %v242_v30 = vld [vmem:[%s708_s2] sm:$0x1] (!%p333_p7) }
  0x3e   : > { %v209_v4 = vadd.f32 %v208_v2, %v206_v1  ;;  %v218_v5 = vrot.slane %v217_v3, 4 }
  0x40   : > { %v210_v6 = vrot.slane %v209_v4, 2  ;;  %v219_v7 = vadd.f32 %v218_v5, %v217_v3 }
  0x42   : > { %v211_v8 = vadd.f32 %v210_v6, %v209_v4  ;;  %v220_v9 = vrot.slane %v219_v7, 2 }
  0x44   : > { %v212_v10 = vrot.slane %v211_v8, 1  ;;  %v221_v11 = vadd.f32 %v220_v9, %v219_v7 }
  0x46   : > { %v213_v13 = vadd.f32 %v212_v10, %v211_v8  ;;  %v222_v14 = vrot.slane %v221_v11, 1  ;;  %229 = sbr.rel (%p333_p7) target bundleno = 110 (0x6e), region = 44 }
  0x48   : > { %v214_v16 = vadd.f32 %v213_v13, %v207_v12  ;;  %v223_v17 = vadd.f32 %v222_v14, %v221_v11 }
  0x4a   : > { %215 = vst [vmem:[#allocation2] sm:$0x1] %v214_v16  ;;  %v224_v18 = vadd.f32 %v223_v17, %v216_v15 }
  0x4c   : > { %225 = vst [vmem:[#allocation3] sm:$0x1] %v224_v18 }
  0x51   : > { %v230_v19 = vld [vmem:[#allocation2] sm:$0x1] }
  0x52   : > { %v231_v21 = vmul.f32 0.041666668, %v230_v19 }
  0x53   : > { %v232_v20 = vld [vmem:[#allocation3] sm:$0x1] }
  0x54   : > { %v233_v22 = vmul.f32 0.041666668, %v232_v20  ;;  %v234_v23 = vmul.f32 %v231_v21, %v231_v21 }
  0x56   : > { %v235_v24 = vsub.f32 %v233_v22, %v234_v23 }
  0x58   : > { %v236_v25 = vmax.f32 %v235_v24, 0.0 }
  0x5a   : > { %v237_v26 = vadd.f32 1e-05, %v236_v25 }
  0x5c   : > { %394 = vrsqrt.f32 %v237_v26 }
  0x66   : > { %v395_v28 = vpop.eup %394 }
  0x67   : > { %v240_v29 = vmul.f32 %v395_v28, %v239_v27 }
  0x69   : > { %241 = vst [vmem:[#allocation7] sm:$0x1] %v240_v29  ;;  %v243_v31 = vmul.f32 %v240_v29, %v231_v21 }
  0x6b   : > { %v244_v32 = vsub.f32 %v242_v30, %v243_v31 }
  0x6d   : > { %245 = vst [vmem:[#allocation8] sm:$0x1] %v244_v32 }
  0x6e PF: > { %p355_p8 = scmp.eq.s32.totalorder %s570_s19, 2  ;;  %s524_s6 = smov [#allocation7]  }
  0x6f   : > { %s253_s7 = sshll.u32 %s524_s6, 4  ;;  %s525_s8 = smov [#allocation8]   ;;  %s254_s7 = int_to_ptr.vmem [resolvable:$true] %s253_s7 }
  0x70   : > { %s264_s9 = sshll.u32 %s525_s8, 4  ;;  %s426_s10 = scalar_lea.vmem %s254_s7, 16  ;;  %s265_s9 = int_to_ptr.vmem [resolvable:$true] %s264_s9 }
  0x71   : > { %p427_p10 = scmp.ne.s32.totalorder %s254_s7, %s426_s10  ;;  %s432_s11 = scalar_lea.vmem %s254_s7, 32 }
  0x72   : > { %p433_p11 = scmp.lt.s32.totalorder %s254_s7, %s254_s7  ;;  %p434_p13 = scmp.lt.s32.totalorder %s432_s11, %s426_s10 }
  0x73   : > { %p428_p5 = pnand %p427_p10, %p355_p8 }
  0x74   : > { %p435_p1 = por %p434_p13, %p433_p11 }
  0x75   : > { %p429_p6 = pneg %p428_p5 }
  0x77   : > { %p436_p2 = pnand %p435_p1, %p429_p6 }
  0x79   : > { %439 = shalt.err (!%p436_p2)
}
  0x7a   : > { %s440_s14 = scalar_lea.hbm %s709_s3, 16 }
  0x7b   : > { %p441_p3 = scmp.ne.s32.totalorder %s709_s3, %s440_s14  ;;  %p446_p12 = scmp.lt.u32.totalorder %s440_s14, %s709_s3 }
  0x7d   : > { %p442_p0 = pnand %p441_p3, %p355_p8 }
  0x7f   : > { %p443_p4 = pneg %p442_p0 }
  0x81   : > { %p448_p9 = pnand %p446_p12, %p443_p4 }
  0x83   : > { %451 = shalt.err (!%p448_p9)
}
  0x84   : > { %343 = dma.vmem_to_hbm [thread:$0]  (%p355_p8), %s254_s7, 16, %s709_s3, [#allocation6]  }
  0x85   : > { %s452_s28 = scalar_lea.vmem %s265_s9, 16  ;;  %s458_s29 = scalar_lea.vmem %s265_s9, 32 }
  0x86   : > { %p453_p7 = scmp.ne.s32.totalorder %s265_s9, %s452_s28  ;;  %p459_p6 = scmp.lt.s32.totalorder %s265_s9, %s265_s9 }
  0x87   : > { %p460_p11 = scmp.lt.s32.totalorder %s458_s29, %s452_s28 }
  0x88   : > { %p454_p10 = pnand %p453_p7, %p355_p8 }
  0x89   : > { %p461_p13 = por %p460_p11, %p459_p6 }
  0x8a   : > { %p455_p5 = pneg %p454_p10 }
  0x8c   : > { %p462_p1 = pnand %p461_p13, %p455_p5 }
  0x8e   : > { %465 = shalt.err (!%p462_p1)
}
  0x8f   : > { %s466_s30 = scalar_lea.hbm %s710_s4, 16 }
  0x90   : > { %p467_p2 = scmp.ne.s32.totalorder %s710_s4, %s466_s30  ;;  %p472_p4 = scmp.lt.u32.totalorder %s466_s30, %s710_s4 }
  0x92   : > { %p468_p3 = pnand %p467_p2, %p355_p8 }
  0x94   : > { %p469_p0 = pneg %p468_p3 }
  0x96   : > { %p474_p12 = pnand %p472_p4, %p469_p0 }
  0x98   : > { %477 = shalt.err (!%p474_p12)
}
  0x99   : > { %345 = dma.vmem_to_hbm [thread:$0]  (%p355_p8), %s265_s9, 16, %s710_s4, [#allocation9]  }
  0x9a   : > { %499 = dma.done.wait (%p355_p8), [#allocation6], 16  }
  0x9b   : > { %501 = vsyncadd (%p355_p8), [#allocation6], 4294967280 }
  0x9c   : > { %503 = dma.done.wait (%p355_p8), [#allocation9], 16  }
  0x9d   : > { %505 = vsyncadd (%p355_p8), [#allocation9], 4294967280 }
  0x9e PF: > { %p17_p9 = scmp.ge.s32.totalorder %s573_s20, 5   ;;  %s715_s15 = smov %s512_s16 }
  0x9f   : > { %s716_s16 = smov %s516_s17  ;;  %s717_s17 = smov %s583_s23 }
  0xa0   : > { %s718_s18 = smov %s573_s20  ;;  %19 = sbr.rel (!%p17_p9) target bundleno = 5 (0x5), region = 85 }
  0xa7   :  { %281 = vsyncpa [#allocation5], 1 }
  0xa8   :  { %283 = vsyncpa [#allocation5 + $0x1], 1 }
  0xa9   :  { %284 = vsyncpa [#allocation6], 1 }
  0xaa   :  { %286 = vsyncpa [#allocation6 + $0x1], 1 }
  0xab   :  { %287 = vsyncpa [#allocation9], 1 }

</bundles_post_ra>
